<compile_context>
chip_gen: v7x
topology: tpu7x:2x2x1
jax: 0.10.0
libtpu: 0.0.40
codegen_flags: <defaults>
</compile_context>

<pallas_src>
import jax
import jax.numpy as jnp
from jax import lax
from jax.experimental import pallas as pl
from jax.experimental.pallas import tpu as pltpu


def _round_up(v, m):
    return ((v + m - 1) // m) * m


# --------------------------------------------------------------------------
# Pass 1: single-pass BatchNorm statistics (sum and sum of squares per feature)
# --------------------------------------------------------------------------
def bn_stats_kernel(x_ref, sum_ref, sq_ref):
    @pl.when(pl.program_id(0) == 0)
    def _():
        sum_ref[...] = jnp.zeros_like(sum_ref)
        sq_ref[...] = jnp.zeros_like(sq_ref)

    x = x_ref[...].astype(jnp.float32)               # (Tc, Np, D)
    xr = x.reshape(-1, x.shape[-1])                   # (Tc*Np, D)
    sum_ref[...] += jnp.sum(xr, axis=0, keepdims=True)
    sq_ref[...] += jnp.sum(xr * xr, axis=0, keepdims=True)


# --------------------------------------------------------------------------
# Pass 2: LSTM recurrence over time chunks (BN already folded into W_ih / bias)
# --------------------------------------------------------------------------
def lstm_chunk_kernel(x_ref, wih_ref, whh_ref, bias_ref, out_ref,
                      h_scr, c_scr, gx_scr):
    Tc, Nc, D = x_ref.shape
    Hp = h_scr.shape[-1]

    # New batch chunk -> reset the recurrent state.
    @pl.when(pl.program_id(1) == 0)
    def _():
        h_scr[...] = jnp.zeros_like(h_scr)
        c_scr[...] = jnp.zeros_like(c_scr)

    # One big MXU matmul for the whole chunk's input projection (bias folded in
    # once) -- off the serial critical path, stored in VMEM scratch.
    xb = x_ref[...].astype(jnp.float32).reshape(Tc * Nc, D)
    gx = jnp.dot(xb, wih_ref[...], preferred_element_type=jnp.float32) + bias_ref[...]
    gx_scr[...] = gx.reshape(Tc, Nc, 4 * Hp)

    whh = whh_ref[...]                                 # (Hp, 4Hp)

    def sig(v):
        # sigmoid via tanh identity: one EUP op, the mul/add rides free VALU slots.
        return 0.5 * jnp.tanh(0.5 * v) + 0.5

    def step(t, carry):
        h, c = carry                                   # (Nc, Hp) each, f32
        gates = gx_scr[t] + jnp.dot(h, whh, preferred_element_type=jnp.float32)
        i = sig(gates[:, 0 * Hp:1 * Hp])
        f = sig(gates[:, 1 * Hp:2 * Hp])
        g = jnp.tanh(gates[:, 2 * Hp:3 * Hp])
        o = sig(gates[:, 3 * Hp:4 * Hp])
        c = f * c + i * g
        h = o * jnp.tanh(c)
        out_ref[t] = h.astype(out_ref.dtype)           # lane-dense (Hp % 128 == 0)
        return (h, c)

    h, c = lax.fori_loop(0, Tc, step, (h_scr[...], c_scr[...]), unroll=True)
    h_scr[...] = h
    c_scr[...] = c


# --------------------------------------------------------------------------
# Wrapper
# --------------------------------------------------------------------------
def batch_rnn_forward(x, gamma, beta, w_ih, w_hh, b_ih, b_hh, *,
                      time_chunk=4, batch_chunk=8, eps=1e-5):
    """x: (T, N, D); w_ih: (4H, D); w_hh: (4H, H); b_*: (4H,)."""
    f32 = jnp.float32
    T, N, D = x.shape
    H = w_hh.shape[1]

    Hp = _round_up(H, 128)                  # lane-aligned gate width
    G4 = 4 * Hp
    Np = _round_up(N, 8)                    # sublane-aligned batch
    Nc = _round_up(min(batch_chunk, Np), 8)
    Np = _round_up(Np, Nc)
    Tc = max(1, min(time_chunk, T))
    Tp = _round_up(T, Tc)
    n_t = Tp // Tc
    n_b = Np // Nc

    # Zero-pad input. Zeros don't perturb the stat sums (we divide by the real
    # count) and padded rows/steps are sliced off at the end.
    x_p = jnp.zeros((Tp, Np, D), f32).at[:T, :N, :].set(x.astype(f32))

    # ---- pass 1: BN statistics ----
    sums, sqs = pl.pallas_call(
        bn_stats_kernel,
        grid=(n_t,),
        in_specs=[pl.BlockSpec((Tc, Np, D), lambda t: (t, 0, 0))],
        out_specs=[pl.BlockSpec((1, D), lambda t: (0, 0)),
                   pl.BlockSpec((1, D), lambda t: (0, 0))],
        out_shape=[jax.ShapeDtypeStruct((1, D), f32),
                   jax.ShapeDtypeStruct((1, D), f32)],
        compiler_params=pltpu.CompilerParams(
            dimension_semantics=("arbitrary",)),
        cost_estimate=pl.CostEstimate(
            flops=3 * Tp * Np * D, transcendentals=0,
            bytes_accessed=4 * (Tp * Np * D + 2 * D)),
    )(x_p)

    cnt = jnp.float32(T * N)                           # real element count
    mean = sums / cnt                                  # (1, D)
    var = sqs / cnt - mean * mean                      # biased variance (train-mode BN)
    scale = gamma.reshape(1, D).astype(f32) * lax.rsqrt(var + eps)
    shift = beta.reshape(1, D).astype(f32) - mean * scale

    # ---- pad LSTM weights into lane-aligned per-gate blocks (i, f, g, o) ----
    wih_t = jnp.transpose(w_ih).astype(f32)            # (D, 4H)
    whh_t = jnp.transpose(w_hh).astype(f32)            # (H, 4H)
    bias = (b_ih + b_hh).astype(f32)                   # (4H,)

    wih_p = jnp.zeros((D, G4), f32)
    whh_p = jnp.zeros((Hp, G4), f32)
    bias_p = jnp.zeros((1, G4), f32)
    for k in range(4):
        wih_p = wih_p.at[:, k * Hp:k * Hp + H].set(wih_t[:, k * H:(k + 1) * H])
        whh_p = whh_p.at[:H, k * Hp:k * Hp + H].set(whh_t[:, k * H:(k + 1) * H])
        bias_p = bias_p.at[0, k * Hp:k * Hp + H].set(bias[k * H:(k + 1) * H])

    # Fold the BN affine into the input projection:
    #   xn @ W = x @ (scale^T * W) + shift @ W
    wih_scaled = wih_p * jnp.transpose(scale)          # (D, G4)
    bias_full = bias_p + jnp.dot(shift, wih_p)         # (1, G4)

    # VMEM budget for the monolithic-per-chunk residency (double-buffered I/O).
    blk_bytes = 4 * (2 * Tc * Nc * D + 2 * Tc * Nc * Hp
                     + 2 * (D * G4 + Hp * G4 + G4)
                     + 2 * Nc * Hp + Tc * Nc * G4)
    vmem_limit = min(64 * 1024 * 1024, max(8 * 1024 * 1024, 2 * blk_bytes))

    # ---- pass 2: LSTM recurrence ----
    out_p = pl.pallas_call(
        lstm_chunk_kernel,
        grid=(n_b, n_t),
        in_specs=[
            pl.BlockSpec((Tc, Nc, D), lambda b, t: (t, b, 0)),
            pl.BlockSpec((D, G4), lambda b, t: (0, 0)),
            pl.BlockSpec((Hp, G4), lambda b, t: (0, 0)),
            pl.BlockSpec((1, G4), lambda b, t: (0, 0)),
        ],
        out_specs=pl.BlockSpec((Tc, Nc, Hp), lambda b, t: (t, b, 0)),
        out_shape=jax.ShapeDtypeStruct((Tp, Np, Hp), x.dtype),
        scratch_shapes=[
            pltpu.VMEM((Nc, Hp), f32),                 # h carry (persists across chunks)
            pltpu.VMEM((Nc, Hp), f32),                 # c carry
            pltpu.VMEM((Tc, Nc, G4), f32),             # per-chunk input-gate projections
        ],
        compiler_params=pltpu.CompilerParams(
            dimension_semantics=("parallel", "arbitrary"),  # batch chunks shard across TCs (v7x)
            vmem_limit_bytes=int(vmem_limit)),
        cost_estimate=pl.CostEstimate(
            flops=2 * Tp * Np * G4 * (D + Hp) + 10 * Tp * Np * Hp,
            transcendentals=5 * Tp * Np * Hp,
            bytes_accessed=4 * (Tp * Np * D + Tp * Np * Hp
                                + D * G4 + Hp * G4 + G4)),
    )(x_p, wih_scaled, whh_p, bias_full)

    return out_p[:T, :N, :H]


# --------------------------------------------------------------------------
# Pure-JAX reference (PyTorch semantics) for a sanity check
# --------------------------------------------------------------------------
def _reference(x, gamma, beta, w_ih, w_hh, b_ih, b_hh, eps=1e-5):
    T, N, D = x.shape
    H = w_hh.shape[1]
    xf = x.reshape(T * N, D)
    mean = xf.mean(0)
    var = ((xf - mean) ** 2).mean(0)
    xn = ((xf - mean) * lax.rsqrt(var + eps) * gamma + beta).reshape(T, N, D)

    def step(carry, x_t):
        h, c = carry
        gates = x_t @ w_ih.T + h @ w_hh.T + b_ih + b_hh
        i, f, g, o = jnp.split(gates, 4, axis=-1)
        i, f, o = jax.nn.sigmoid(i), jax.nn.sigmoid(f), jax.nn.sigmoid(o)
        g = jnp.tanh(g)
        c = f * c + i * g
        h = o * jnp.tanh(c)
        return (h, c), h

    init = (jnp.zeros((N, H), jnp.float32), jnp.zeros((N, H), jnp.float32))
    _, hs = lax.scan(step, init, xn)
    return hs


if __name__ == "__main__":
    # Small shapes consistent with BatchRNN(input_size=32, hidden_size=32).
    T, N, D, H = 8, 4, 32, 32

    key = jax.random.PRNGKey(0)
    kx, k1, k2, k3, k4 = jax.random.split(key, 5)

    x = jax.random.normal(kx, (T, N, D), dtype=jnp.float32)

    # BatchNorm1d params (PyTorch default init: weight=1, bias=0).
    gamma = jnp.ones((D,), jnp.float32)
    beta = jnp.zeros((D,), jnp.float32)

    # LSTM params, PyTorch-style uniform(-1/sqrt(H), 1/sqrt(H)) init,
    # gate order (i, f, g, o) along the 4H axis.
    k_scale = 1.0 / jnp.sqrt(jnp.float32(H))
    w_ih = jax.random.uniform(k1, (4 * H, D), jnp.float32, -k_scale, k_scale)
    w_hh = jax.random.uniform(k2, (4 * H, H), jnp.float32, -k_scale, k_scale)
    b_ih = jax.random.uniform(k3, (4 * H,), jnp.float32, -k_scale, k_scale)
    b_hh = jax.random.uniform(k4, (4 * H,), jnp.float32, -k_scale, k_scale)

    out = batch_rnn_forward(x, gamma, beta, w_ih, w_hh, b_ih, b_hh)
    out = jax.block_until_ready(out)
    assert out.shape == (T, N, H)

    ref = jax.block_until_ready(_reference(x, gamma, beta, w_ih, w_hh, b_ih, b_hh))
    assert bool(jnp.all(jnp.isfinite(out)))
    assert bool(jnp.allclose(out, ref, atol=5e-2, rtol=5e-2)), \
        f"max abs diff {float(jnp.max(jnp.abs(out - ref)))}"

    print("KERNEL_OK")
</pallas_src>

<mosaic_0001>
module attributes {stable_mosaic.version = 11 : i64} {
  func.func @bn_stats_kernel(%arg0: i32, %arg1: memref<4x8x32xf32, #tpu.memory_space<vmem>>, %arg2: memref<1x32xf32, #tpu.memory_space<vmem>>, %arg3: memref<1x32xf32, #tpu.memory_space<vmem>>) attributes {dimension_semantics = [#tpu.dimension_semantics<arbitrary>], iteration_bounds = array<i64: 2>, scalar_prefetch = 0 : i64, scratch_operands = 0 : i64, tpu.core_type = #tpu.core_type<tc>, window_params = [{transform_indices = @transform_0, window_bounds = array<i64: 4, 8, 32>}, {pipeline_mode = #tpu.pipeline_mode<synchronous>, transform_indices = @transform_1, window_bounds = array<i64: 1, 32>}, {pipeline_mode = #tpu.pipeline_mode<synchronous>, transform_indices = @transform_2, window_bounds = array<i64: 1, 32>}]} {
    %c0_i32 = arith.constant 0 : i32
    %0 = arith.cmpi eq, %arg0, %c0_i32 : i32
    %1 = arith.extui %0 : i1 to i32
    %c0_i32_0 = arith.constant 0 : i32
    %2 = arith.cmpi ne, %1, %c0_i32_0 : i32
    scf.if %2 {
      %cst_12 = arith.constant 0.000000e+00 : f32
      %16 = vector.broadcast %cst_12 : f32 to vector<1x32xf32>
      %c0_13 = arith.constant 0 : index
      %c0_14 = arith.constant 0 : index
      %17 = vector.load %arg2[%c0_13, %c0_14] : memref<1x32xf32, #tpu.memory_space<vmem>>, vector<1x32xf32>
      tpu.vector_store %arg2[%c0_13, %c0_14], %16 {strides = array<i32>} : memref<1x32xf32, #tpu.memory_space<vmem>>, vector<1x32xf32>,
      %cst_15 = arith.constant 0.000000e+00 : f32
      %18 = vector.broadcast %cst_15 : f32 to vector<1x32xf32>
      %c0_16 = arith.constant 0 : index
      %c0_17 = arith.constant 0 : index
      %19 = vector.load %arg3[%c0_16, %c0_17] : memref<1x32xf32, #tpu.memory_space<vmem>>, vector<1x32xf32>
      tpu.vector_store %arg3[%c0_16, %c0_17], %18 {strides = array<i32>} : memref<1x32xf32, #tpu.memory_space<vmem>>, vector<1x32xf32>,
    } else {
    }
    %c0 = arith.constant 0 : index
    %c0_1 = arith.constant 0 : index
    %c0_2 = arith.constant 0 : index
    %3 = vector.load %arg1[%c0, %c0_1, %c0_2] : memref<4x8x32xf32, #tpu.memory_space<vmem>>, vector<4x8x32xf32>
    %4 = vector.shape_cast %3 : vector<4x8x32xf32> to vector<32x32xf32>
    %c0_3 = arith.constant 0 : index
    %c0_4 = arith.constant 0 : index
    %5 = vector.load %arg2[%c0_3, %c0_4] : memref<1x32xf32, #tpu.memory_space<vmem>>, vector<1x32xf32>
    %cst = arith.constant dense<0.000000e+00> : vector<32xf32>
    %6 = vector.multi_reduction <add>, %4, %cst [0] : vector<32x32xf32> to vector<32xf32>
    %7 = vector.shape_cast %6 : vector<32xf32> to vector<1x32xf32>
    %8 = arith.addf %5, %7 : vector<1x32xf32>
    %c0_5 = arith.constant 0 : index
    %c0_6 = arith.constant 0 : index
    %9 = vector.load %arg2[%c0_5, %c0_6] : memref<1x32xf32, #tpu.memory_space<vmem>>, vector<1x32xf32>
    tpu.vector_store %arg2[%c0_5, %c0_6], %8 {strides = array<i32>} : memref<1x32xf32, #tpu.memory_space<vmem>>, vector<1x32xf32>,
    %c0_7 = arith.constant 0 : index
    %c0_8 = arith.constant 0 : index
    %10 = vector.load %arg3[%c0_7, %c0_8] : memref<1x32xf32, #tpu.memory_space<vmem>>, vector<1x32xf32>
    %11 = arith.mulf %4, %4 : vector<32x32xf32>
    %cst_9 = arith.constant dense<0.000000e+00> : vector<32xf32>
    %12 = vector.multi_reduction <add>, %11, %cst_9 [0] : vector<32x32xf32> to vector<32xf32>
    %13 = vector.shape_cast %12 : vector<32xf32> to vector<1x32xf32>
    %14 = arith.addf %10, %13 : vector<1x32xf32>
    %c0_10 = arith.constant 0 : index
    %c0_11 = arith.constant 0 : index
    %15 = vector.load %arg3[%c0_10, %c0_11] : memref<1x32xf32, #tpu.memory_space<vmem>>, vector<1x32xf32>
    tpu.vector_store %arg3[%c0_10, %c0_11], %14 {strides = array<i32>} : memref<1x32xf32, #tpu.memory_space<vmem>>, vector<1x32xf32>,
    return
  }
  func.func @transform_0(%arg0: i32) -> (i32, i32, i32) {
    %c0_i32 = arith.constant 0 : i32
    %c0_i32_0 = arith.constant 0 : i32
    %c0_i32_1 = arith.constant 0 : i32
    return %arg0, %c0_i32, %c0_i32_0 : i32, i32, i32
  }
  func.func @transform_1(%arg0: i32) -> (i32, i32) {
    %c0_i32 = arith.constant 0 : i32
    %c0_i32_0 = arith.constant 0 : i32
    %c0_i32_1 = arith.constant 0 : i32
    return %c0_i32, %c0_i32_0 : i32, i32
  }
  func.func @transform_2(%arg0: i32) -> (i32, i32) {
    %c0_i32 = arith.constant 0 : i32
    %c0_i32_0 = arith.constant 0 : i32
    %c0_i32_1 = arith.constant 0 : i32
    return %c0_i32, %c0_i32_0 : i32, i32
  }
}

</mosaic_0001>

<bundles_post_ra>
// kernel: tpu_custom_call.1
= control target key start
LH: loop header
LB: loop body
LE: loop exit
PB: predicated region body
PF: predicated region fallthrough
CT: control target
= control target key end

     0   :  { %8 = vsyncpa [#allocation3], 0  ;;  %s664_s0 = inlined_call_operand.hbm [shape: f32[8,8,32], index: 0, kind: input, shape index: {}]   ;;  %s665_s1 = inlined_call_operand.hbm [shape: f32[1,32], index: 1, kind: output, shape index: {0}]   ;;  %s666_s2 = inlined_call_operand.hbm [shape: f32[1,32], index: 2, kind: output, shape index: {1}]  }
   0x1   :  { %10 = vsyncpa [#allocation3 + $0x1], 0 }
   0x2   :  { %11 = vsyncpa [#allocation4], 0 }
   0x3   :  { %12 = vsyncpa [#allocation7], 0  ;;  %s497_s9 = smov 0   ;;  %s499_s10 = smov 0  }
   0x4   :  { %s501_s11 = smov 0   ;;  %s503_s12 = smov 0  }
   0x5 LB: > { %s516_s13 = sadd.s32 4294967295, %s474_s12   ;;  %s519_s14 = sadd.s32 1, %s474_s12   ;;  %s474_s12 = sphi %s503_s12, %s673_s12   ;;  %s470_s11 = sphi %s501_s11, %s672_s11   ;;  %s466_s10 = sphi %s499_s10, %s671_s10   ;;  %s462_s9 = sphi %s497_s9, %s670_s9  }
   0x6   : > { %s22_s15 = ssub.s32 %s474_s12, %s519_s14  ;;  %s25_s16 = sadd.s32 1, %s470_s11 }
   0x7   : > { %p23_p0 = scmp.eq.s32.totalorder %s22_s15, 0  ;;  %p32_p1 = scmp.ne.s32.totalorder %s470_s11, %s466_s10 }
   0x8   : > { %p33_p2 = scmp.eq.s32.totalorder %s474_s12, 0  ;;  %p38_p3 = scmp.ne.s32.totalorder %s466_s10, %s462_s9 }
   0x9   : > { %s529_s17 = scalar_select %p23_p0, %s470_s11, %s25_s16  }
   0xa   : > { %p34_p4 = por %p33_p2, %p32_p1  ;;  %p39_p5 = scmp.eq.s32.totalorder %s516_s13, 0 }
   0xb   : > { %p308_p6 = scmp.lt.s32.totalorder %s474_s12, 2  ;;  %s104_s19 = sand.u32 1, %s470_s11  }
   0xc   : > { %p533_p7 = por %p39_p5, %p38_p3  ;;  %s281_s20 = sshll.u32 %s104_s19, 5 }
   0xd   : > { %s293_s21 = sshll.u32 %s474_s12, 9  ;;  %s108_s25 = scalar_lea.vmem [#allocation2], %s281_s20 }
   0xe   : > { %s542_s24 = scalar_lea.hbm %s664_s0, %s293_s21  ;;  %s115_s26 = sshll.u32 %s108_s25, 4  ;;  %s544_s26 = int_to_ptr.vmem [resolvable:$true] %s115_s26 }
   0xf   : > { %p546_p8 = pnand %p308_p6, %p34_p4  ;;  %s551_s28 = scalar_lea.sflag [#allocation3], %s104_s19 }
  0x10   : > { %s350_s29 = scalar_lea.hbm %s542_s24, 512  ;;  %s355_s4 = scalar_lea.hbm %s664_s0, 1024 }
  0x11   : > { %p351_p10 = scmp.ne.s32.totalorder %s542_s24, %s350_s29  ;;  %p352_p11 = pneg %p546_p8 }
  0x12   : > { %p356_p0 = scmp.lt.u32.totalorder %s542_s24, %s664_s0  ;;  %p357_p1 = scmp.lt.u32.totalorder %s355_s4, %s350_s29 }
  0x13   : > { %p353_p12 = pnand %p352_p11, %p351_p10  ;;  %p359_p3 = scmp.lt.u32.totalorder %s350_s29, %s542_s24 }
  0x14   : > { %p358_p2 = por %p357_p1, %p356_p0 }
  0x15   : > { %p354_p13 = pneg %p353_p12 }
  0x16   : > { %p360_p4 = por %p359_p3, %p358_p2 }
  0x18   : > { %p361_p5 = pnand %p360_p4, %p354_p13 }
  0x1a   : > { %364 = shalt.err (!%p361_p5)
}
  0x1b   : > { %s365_s7 = scalar_lea.vmem %s544_s26, 512  ;;  %s476_s8 = smov [#allocation2]  }
  0x1c   : > { %p366_p6 = scmp.ne.s32.totalorder %s544_s26, %s365_s7  ;;  %s370_s9 = sshll.u32 %s476_s8, 4  ;;  %s371_s9 = int_to_ptr.vmem [resolvable:$false] %s370_s9 }
  0x1d   : > { %s372_s15 = scalar_lea.vmem %s371_s9, 1024  ;;  %p373_p9 = scmp.lt.s32.totalorder %s544_s26, %s371_s9 }
  0x1e   : > { %p368_p10 = pnand %p366_p6, %p352_p11  ;;  %p374_p0 = scmp.lt.s32.totalorder %s372_s15, %s365_s7 }
  0x20   : > { %p369_p12 = pneg %p368_p10  ;;  %p375_p1 = por %p374_p0, %p373_p9 }
  0x22   : > { %p376_p2 = pnand %p375_p1, %p369_p12 }
  0x24   : > { %379 = shalt.err (!%p376_p2)
}
  0x25   : > { %s477_s16 = smov 128   ;;  %s478_s19 = smov 8  }
  0x26   : > { %307 = dma.hbm_to_vmem [thread:$0]  (!%p546_p8), %s542_s24, 512, %s544_s26, %s551_s28, %s477_s16, %s477_s16, %s478_s19  }
  0x27   : > { %p123_p11 = scmp.lt.s32.totalorder %s474_s12, 3  ;;  %p669_p13 = scmp.ge.s32.totalorder %s474_s12, 1 }
  0x29   : > { %p124_p3 = pnand %p669_p13, %p123_p11 }
  0x2a   : > { %s129_s20 = sand.u32 (!%p124_p3), 1, %s466_s10  }
  0x2b   : > { %127 = sbr.rel (%p124_p3) target bundleno = 121 (0x79), region = 24  ;;  %s285_s21 = sshll.u32 (!%p124_p3), %s129_s20, 5 }
  0x2c   : > { %s130_s22 = scalar_lea.sflag (!%p124_p3), [#allocation3], %s129_s20  ;;  %s133_s23 = scalar_lea.vmem (!%p124_p3), [#allocation2], %s285_s21 }
  0x32   : > { %449 = dma.done.wait (%p533_p7), %s130_s22, 512  }
  0x33   : > { %451 = vsyncadd (%p533_p7), %s130_s22, 4294966784  ;;  %p286_p9 = scmp.ne.s32.totalorder %s516_s13, 0 }
  0x34   : > { %vm154_vm0 = vcmask (!%p286_p9), 253952   ;;  %v479_v0 = vmov (!%p286_p9), 0.0  }
  0x35   : > { %153 = sbr.rel (%p286_p9) target bundleno = 60 (0x3c), region = 32  ;;  %155 = vst.msk [vmem:[#allocation5] sm:$0x1] (!%p286_p9), %vm154_vm0, %v479_v0  ;;  %156 = vst.msk [vmem:[#allocation6] sm:$0x1] (!%p286_p9), %vm154_vm0, %v479_v0 }
  0x3c PF: > { %v157_v1 = vld [vmem:[%s133_s23] sm:$0xff]  ;;  %v158_v2 = vld [vmem:[%s133_s23 + $0x8] sm:$0xff]  ;;  %v159_v3 = vld [vmem:[%s133_s23 + $0x10] sm:$0xff]  ;;  %vm162_vm1 = vcmask 261120   ;;  %s480_s12 = smov [#allocation5]   ;;  %vm177_vm2 = vcmask 253952  }
  0x3d   : > { %v160_v4 = vld [vmem:[%s133_s23 + $0x18] sm:$0xff]  ;;  %v163_v5 = vsel %vm162_vm1, %v157_v1, 0.0  ;;  %v164_v6 = vsel %vm162_vm1, %v158_v2, 0.0  ;;  %v166_v7 = vsel %vm162_vm1, %v159_v3, 0.0  ;;  %v180_v8 = vmul.f32 %v157_v1, %v157_v1  ;;  %v161_v31 = vld [vmem:[#allocation5] sm:$0x1] }
  0x3e   : > { %v165_v9 = vadd.f32 %v164_v6, %v163_v5  ;;  %v181_v10 = vmul.f32 %v158_v2, %v158_v2  ;;  %v182_v11 = vmul.f32 %v159_v3, %v159_v3  ;;  %v168_v12 = vsel %vm162_vm1, %v160_v4, 0.0  ;;  %s206_s18 = sshll.u32 %s480_s12, 4  ;;  %p309_p7 = scmp.eq.s32.totalorder %s516_s13, 1  ;;  %v179_v36 = vld [vmem:[#allocation6] sm:$0x1]  ;;  %s207_s18 = int_to_ptr.vmem [resolvable:$true] %s206_s18 }
  0x3f   : > { %v183_v13 = vmul.f32 %v160_v4, %v160_v4  ;;  %v184_v14 = vsel %vm162_vm1, %v180_v8, 0.0  ;;  %s481_s24 = smov [#allocation6]   ;;  %s380_s26 = scalar_lea.vmem %s207_s18, 16 }
  0x40   : > { %v167_v15 = vadd.f32 %v166_v7, %v165_v9  ;;  %v185_v16 = vsel %vm162_vm1, %v181_v10, 0.0  ;;  %v187_v17 = vsel %vm162_vm1, %v182_v11, 0.0  ;;  %s217_s25 = sshll.u32 %s481_s24, 4  ;;  %p381_p8 = scmp.ne.s32.totalorder %s207_s18, %s380_s26  ;;  %s598_s25 = int_to_ptr.vmem [resolvable:$true] %s217_s25 }
  0x41   : > { %v186_v18 = vadd.f32 %v185_v16, %v184_v14  ;;  %v189_v20 = vsel %vm162_vm1, %v183_v13, 0.0  ;;  %s386_s27 = scalar_lea.vmem %s207_s18, 32  ;;  %p387_p6 = scmp.lt.s32.totalorder %s207_s18, %s207_s18 }
  0x42   : > { %v169_v19 = vadd.f32 %v168_v12, %v167_v15  ;;  %p382_p4 = pnand %p381_p8, %p309_p7  ;;  %p388_p10 = scmp.lt.s32.totalorder %s386_s27, %s380_s26 }
  0x43   : > { %v188_v21 = vadd.f32 %v187_v17, %v186_v18 }
  0x44   : > { %v170_v22 = vrot.slane %v169_v19, 4  ;;  %p383_p5 = pneg %p382_p4  ;;  %p389_p12 = por %p388_p10, %p387_p6 }
  0x45   : > { %v190_v23 = vadd.f32 %v189_v20, %v188_v21 }
  0x46   : > { %v171_v24 = vadd.f32 %v170_v22, %v169_v19  ;;  %p390_p0 = pnand %p389_p12, %p383_p5 }
  0x47   : > { %v191_v25 = vrot.slane %v190_v23, 4 }
  0x48   : > { %v172_v26 = vrot.slane %v171_v24, 2 }
  0x49   : > { %v192_v27 = vadd.f32 %v191_v25, %v190_v23 }
  0x4a   : > { %v173_v28 = vadd.f32 %v172_v26, %v171_v24 }
  0x4b   : > { %v193_v29 = vrot.slane %v192_v27, 2 }
  0x4c   : > { %v174_v30 = vrot.slane %v173_v28, 1 }
  0x4d   : > { %v194_v32 = vadd.f32 %v193_v29, %v192_v27 }
  0x4e   : > { %v175_v33 = vadd.f32 %v174_v30, %v173_v28 }
  0x4f   : > { %v195_v34 = vrot.slane %v194_v32, 1 }
  0x50   : > { %v176_v35 = vadd.f32 %v175_v33, %v161_v31 }
  0x51   : > { %v196_v37 = vadd.f32 %v195_v34, %v194_v32 }
  0x52   : > { %178 = vst.msk [vmem:[#allocation5] sm:$0x1] %vm177_vm2, %v176_v35 }
  0x53   : > { %v197_v38 = vadd.f32 %v196_v37, %v179_v36 }
  0x54   : > { %393 = shalt.err (!%p390_p0)
}
  0x55   : > { %s394_s30 = scalar_lea.hbm %s665_s1, 16 }
  0x56   : > { %p395_p1 = scmp.ne.s32.totalorder %s665_s1, %s394_s30  ;;  %p400_p13 = scmp.lt.u32.totalorder %s394_s30, %s665_s1 }
  0x58   : > { %p396_p2 = pnand %p395_p1, %p309_p7 }
  0x5a   : > { %p397_p11 = pneg %p396_p2 }
  0x5c   : > { %p402_p3 = pnand %p400_p13, %p397_p11 }
  0x5e   : > { %405 = shalt.err (!%p402_p3)
}
  0x5f   : > { %297 = dma.vmem_to_hbm [thread:$0]  (%p309_p7), %s207_s18, 16, %s665_s1, [#allocation4]   ;;  %198 = vst.msk [vmem:[#allocation6] sm:$0x1] %vm177_vm2, %v197_v38 }
  0x60   : > { %s406_s9 = scalar_lea.vmem %s598_s25, 16  ;;  %s412_s15 = scalar_lea.vmem %s598_s25, 32 }
  0x61   : > { %p407_p9 = scmp.ne.s32.totalorder %s598_s25, %s406_s9  ;;  %p413_p5 = scmp.lt.s32.totalorder %s598_s25, %s598_s25 }
  0x62   : > { %p414_p6 = scmp.lt.s32.totalorder %s412_s15, %s406_s9 }
  0x63   : > { %p408_p8 = pnand %p407_p9, %p309_p7 }
  0x64   : > { %p415_p10 = por %p414_p6, %p413_p5 }
  0x65   : > { %p409_p4 = pneg %p408_p8 }
  0x67   : > { %p416_p12 = pnand %p415_p10, %p409_p4 }
  0x69   : > { %419 = shalt.err (!%p416_p12)
}
  0x6a   : > { %s420_s20 = scalar_lea.hbm %s666_s2, 16 }
  0x6b   : > { %p421_p0 = scmp.ne.s32.totalorder %s666_s2, %s420_s20  ;;  %p426_p11 = scmp.lt.u32.totalorder %s420_s20, %s666_s2 }
  0x6d   : > { %p422_p1 = pnand %p421_p0, %p309_p7 }
  0x6f   : > { %p423_p2 = pneg %p422_p1 }
  0x71   : > { %p428_p13 = pnand %p426_p11, %p423_p2 }
  0x73   : > { %431 = shalt.err (!%p428_p13)
}
  0x74   : > { %299 = dma.vmem_to_hbm [thread:$0]  (%p309_p7), %s598_s25, 16, %s666_s2, [#allocation7]  }
  0x75   : > { %453 = dma.done.wait (%p309_p7), [#allocation4], 16  }
  0x76   : > { %455 = vsyncadd (%p309_p7), [#allocation4], 4294967280 }
  0x77   : > { %457 = dma.done.wait (%p309_p7), [#allocation7], 16  }
  0x78   : > { %459 = vsyncadd (%p309_p7), [#allocation7], 4294967280 }
  0x79 PF: > { %p15_p3 = scmp.ge.s32.totalorder %s519_s14, 4   ;;  %s670_s9 = smov %s466_s10 }
  0x7a   : > { %s671_s10 = smov %s470_s11  ;;  %s672_s11 = smov %s529_s17 }
  0x7b   : > { %s673_s12 = smov %s519_s14  ;;  %17 = sbr.rel (!%p15_p3) target bundleno = 5 (0x5), region = 73 }
  0x82   :  { %234 = vsyncpa [#allocation3], 1 }
  0x83   :  { %236 = vsyncpa [#allocation3 + $0x1], 1 }
  0x84   :  { %237 = vsyncpa [#allocation4], 1 }
  0x85   :  { %239 = vsyncpa [#allocation4 + $0x1], 1 }
  0x86   :  { %240 = vsyncpa [#allocation7], 1 }

</bundles_post_ra>
